<compile_context>
chip_gen: v5e
topology: v5e:2x2
jax: 0.10.0
libtpu: 0.0.40
codegen_flags: <defaults>
</compile_context>

<pallas_src>
import jax
import jax.numpy as jnp
from jax.experimental import pallas as pl
from jax.experimental.pallas import tpu as pltpu


def _round_up(x, m):
    return ((x + m - 1) // m) * m


def _tpu_vmem_capacity_bytes():
    try:
        return int(pltpu.get_tpu_info().vmem_capacity_bytes)
    except Exception:
        return 128 << 20  # assume v5e/v6e-class if the query is unavailable


def _make_policy_kernel(action_scale, action_bias):
    """Kernel factory; action_scale/action_bias are trace-time constants."""

    def kernel(x_ref, w1_ref, b1_ref, w2_ref, b2_ref, wm_ref, bm_ref, out_ref):
        # state tile arrives f32; cast to bf16 on-chip for the MXU.
        x = x_ref[...].astype(jnp.bfloat16)
        # linear1 + ReLU (MXU bf16 operands, f32 accumulate; f32 elementwise tail)
        h1 = jnp.dot(x, w1_ref[...], preferred_element_type=jnp.float32) + b1_ref[...]
        h1 = jnp.maximum(h1, 0.0).astype(jnp.bfloat16)
        # linear2 + ReLU
        h2 = jnp.dot(h1, w2_ref[...], preferred_element_type=jnp.float32) + b2_ref[...]
        h2 = jnp.maximum(h2, 0.0).astype(jnp.bfloat16)
        # mean head + tanh (+ optional affine — skipped when scale=1, bias=0)
        m = jnp.dot(h2, wm_ref[...], preferred_element_type=jnp.float32) + bm_ref[...]
        m = jnp.tanh(m)
        if action_scale != 1.0:
            m = m * action_scale
        if action_bias != 0.0:
            m = m + action_bias
        out_ref[...] = m.astype(out_ref.dtype)

    return kernel


def prepare_params(params):
    """One-time prep (hoisted out of the hot path): pad weights to lane-dense
    multiples of 128 and cast to bf16; biases stay f32.  Weights are stored
    transposed as (in_features, out_features); biases as (1, out_features).
    Zero padding preserves semantics (relu(0)=0; padded Wm rows/cols are 0)."""
    w1, b1, w2, b2, wm, bm = params
    d_in, h = w1.shape
    a = wm.shape[1]
    d_in_p, h_p, a_p = _round_up(d_in, 128), _round_up(h, 128), _round_up(a, 128)

    def pad2(x, r, c):
        return jnp.pad(x, ((0, r - x.shape[0]), (0, c - x.shape[1])))

    return dict(
        w1=pad2(w1, d_in_p, h_p).astype(jnp.bfloat16),
        b1=pad2(b1, 1, h_p).astype(jnp.float32),
        w2=pad2(w2, h_p, h_p).astype(jnp.bfloat16),
        b2=pad2(b2, 1, h_p).astype(jnp.float32),
        wm=pad2(wm, h_p, a_p).astype(jnp.bfloat16),
        bm=pad2(bm, 1, a_p).astype(jnp.float32),
        dims=(d_in, h, a, d_in_p, h_p, a_p),
    )


def deterministic_policy_forward(state, prepped, *, action_scale=1.0,
                                 action_bias=0.0, out_dtype=jnp.float32):
    """state: (B, num_inputs) f32.  prepped: output of prepare_params().
    Returns the mean action (B, num_actions) in `out_dtype`.
    Accuracy note: bf16 MXU operands (f32 accumulation) => ~3e-2 tolerance
    vs. a full-f32 reference; adequate for RL policies."""
    d_in, h, a, d_in_p, h_p, a_p = prepped["dims"]
    B, d_in_s = state.shape
    assert d_in_s == d_in, "state feature dim does not match prepared params"

    # ---- generation-aware batch tiling ---------------------------------------
    vmem_cap = _tpu_vmem_capacity_bytes()
    big_vmem = vmem_cap >= (96 << 20)          # v5e/v6e (128 MiB) vs v7x (64 MiB)
    max_tile = 1024 if big_vmem else 512
    n_tiles = max(1, pl.cdiv(B, max_tile))
    if (not big_vmem) and B >= 64:             # v7x: keep both TensorCores busy
        n_tiles = max(n_tiles, 2)
    tile_b = _round_up(pl.cdiv(B, n_tiles), 8)  # balances tiles, bounds padding <8/tile
    b_pad = _round_up(B, tile_b)
    grid_steps = b_pad // tile_b

    # Per-call wrapper work touches ONLY the state: zero-pad batch/feature, stay f32.
    x_p = jnp.pad(state, ((0, b_pad - B), (0, d_in_p - d_in)))

    # ---- VMEM budget / cost estimate -----------------------------------------
    out_itemsize = jnp.dtype(out_dtype).itemsize
    weight_bytes = 2 * (d_in_p * h_p + h_p * h_p + h_p * a_p) + 4 * (2 * h_p + a_p)
    io_bytes = 2 * tile_b * (d_in_p * 4 + a_p * out_itemsize)   # double-buffered tiles
    scratch_bytes = 3 * tile_b * h_p * 4                        # f32 intermediates headroom
    need = weight_bytes + io_bytes + scratch_bytes
    upper = min((5 * vmem_cap) // 8, 100 << 20)  # ~80 MiB on v5e/v6e, ~40 MiB on v7x
    vmem_limit = max(16 << 20, min(int(1.5 * need) + (4 << 20), upper))

    cost = pl.CostEstimate(
        flops=2 * b_pad * (d_in_p * h_p + h_p * h_p + h_p * a_p),
        transcendentals=b_pad * a_p,
        bytes_accessed=b_pad * d_in_p * 4 + weight_bytes + b_pad * a_p * out_itemsize,
    )

    kernel = _make_policy_kernel(float(action_scale), float(action_bias))
    const = lambda i: (0, 0)  # weights/biases: DMA'd once, VMEM-resident across the grid

    def run(weight_mode):
        if weight_mode is None:
            wspec = lambda shape: pl.BlockSpec(shape, const)
        else:
            wspec = lambda shape: pl.BlockSpec(shape, const, pipeline_mode=weight_mode)
        return pl.pallas_call(
            kernel,
            out_shape=jax.ShapeDtypeStruct((b_pad, a_p), out_dtype),
            grid_spec=pltpu.PrefetchScalarGridSpec(
                num_scalar_prefetch=0,
                grid=(grid_steps,),
                in_specs=[
                    pl.BlockSpec((tile_b, d_in_p), lambda i: (i, 0)),  # state tile (f32)
                    wspec((d_in_p, h_p)),   # W1
                    wspec((1, h_p)),        # b1
                    wspec((h_p, h_p)),      # W2
                    wspec((1, h_p)),        # b2
                    wspec((h_p, a_p)),      # Wm
                    wspec((1, a_p)),        # bm
                ],
                out_specs=pl.BlockSpec((tile_b, a_p), lambda i: (i, 0)),
            ),
            compiler_params=pltpu.CompilerParams(
                # TODO(synk): try pltpu.CORE_PARALLEL on v7x once verified on the
                # target jaxlib; plain "parallel" is the portable choice here.
                dimension_semantics=(
                    ("parallel",) if grid_steps > 1 else ("arbitrary",)),
                vmem_limit_bytes=int(vmem_limit),
            ),
            cost_estimate=cost,
        )(x_p, prepped["w1"], prepped["b1"], prepped["w2"], prepped["b2"],
          prepped["wm"], prepped["bm"])

    try:
        # Constant-index weights: single-buffer them to halve resident weight VMEM.
        out_p = run(pl.Buffered(1))
    except Exception:
        out_p = run(None)  # fallback: default (double) buffering

    # Slice back to real batch rows and real action columns.
    return out_p[:B, :a]


def init_params(key, num_inputs, num_actions, hidden_dim):
    """Xavier-uniform init (matches weights_init_ in SAC/nets.py); weights
    stored transposed (in_features, out_features), biases (1, out_features)."""
    def xavier(k, fan_in, fan_out):
        limit = jnp.sqrt(6.0 / (fan_in + fan_out))
        return jax.random.uniform(k, (fan_in, fan_out), jnp.float32, -limit, limit)

    k1, k2, k3 = jax.random.split(key, 3)
    w1 = xavier(k1, num_inputs, hidden_dim)
    b1 = jnp.zeros((1, hidden_dim), jnp.float32)
    w2 = xavier(k2, hidden_dim, hidden_dim)
    b2 = jnp.zeros((1, hidden_dim), jnp.float32)
    wm = xavier(k3, hidden_dim, num_actions)
    bm = jnp.zeros((1, num_actions), jnp.float32)
    return (w1, b1, w2, b2, wm, bm)


def reference_forward(state, params, action_scale=1.0, action_bias=0.0):
    w1, b1, w2, b2, wm, bm = params
    h1 = jnp.maximum(state @ w1 + b1, 0.0)
    h2 = jnp.maximum(h1 @ w2 + b2, 0.0)
    return jnp.tanh(h2 @ wm + bm) * action_scale + action_bias


if __name__ == "__main__":
    B, num_inputs, num_actions, hidden_dim = 2, 16, 4, 32

    key = jax.random.PRNGKey(0)
    k_state, k_params = jax.random.split(key)
    state = jax.random.normal(k_state, (B, num_inputs), jnp.float32)
    params = init_params(k_params, num_inputs, num_actions, hidden_dim)

    # Hoisted out of the hot path: pad + cast weights once, reuse every call.
    prepped = prepare_params(params)

    out = deterministic_policy_forward(state, prepped)
    jax.block_until_ready(out)

    ref = reference_forward(state, params)  # full-f32 reference
    assert out.shape == (B, num_actions)
    # bf16 MXU operands (f32 accumulation) => loosened tolerance vs f32 reference
    assert jnp.allclose(out, ref, atol=3e-2, rtol=3e-2), (
        f"max abs err {float(jnp.max(jnp.abs(out - ref)))}")

    print("KERNEL_OK")
</pallas_src>

<mosaic_0001>
module attributes {stable_mosaic.version = 11 : i64} {
  func.func @kernel(%arg0: i32, %arg1: memref<8x128xf32, #tpu.memory_space<vmem>>, %arg2: memref<128x128xbf16, #tpu.memory_space<vmem>>, %arg3: memref<1x128xf32, #tpu.memory_space<vmem>>, %arg4: memref<128x128xbf16, #tpu.memory_space<vmem>>, %arg5: memref<1x128xf32, #tpu.memory_space<vmem>>, %arg6: memref<128x128xbf16, #tpu.memory_space<vmem>>, %arg7: memref<1x128xf32, #tpu.memory_space<vmem>>, %arg8: memref<8x128xf32, #tpu.memory_space<vmem>>) attributes {dimension_semantics = [#tpu.dimension_semantics<arbitrary>], iteration_bounds = array<i64: 1>, scalar_prefetch = 0 : i64, scratch_operands = 0 : i64, tpu.core_type = #tpu.core_type<tc>, window_params = [{transform_indices = @transform_0, window_bounds = array<i64: 8, 128>}, {pipeline_mode = #tpu.pipeline_mode<synchronous>, transform_indices = @transform_1, window_bounds = array<i64: 128, 128>}, {pipeline_mode = #tpu.pipeline_mode<synchronous>, transform_indices = @transform_2, window_bounds = array<i64: 1, 128>}, {pipeline_mode = #tpu.pipeline_mode<synchronous>, transform_indices = @transform_3, window_bounds = array<i64: 128, 128>}, {pipeline_mode = #tpu.pipeline_mode<synchronous>, transform_indices = @transform_4, window_bounds = array<i64: 1, 128>}, {pipeline_mode = #tpu.pipeline_mode<synchronous>, transform_indices = @transform_5, window_bounds = array<i64: 128, 128>}, {pipeline_mode = #tpu.pipeline_mode<synchronous>, transform_indices = @transform_6, window_bounds = array<i64: 1, 128>}, {transform_indices = @transform_7, window_bounds = array<i64: 8, 128>}]} {
    %c0 = arith.constant 0 : index
    %c0_0 = arith.constant 0 : index
    %0 = vector.load %arg1[%c0, %c0_0] : memref<8x128xf32, #tpu.memory_space<vmem>>, vector<8x128xf32>
    %1 = arith.truncf %0 : vector<8x128xf32> to vector<8x128xbf16>
    %c0_1 = arith.constant 0 : index
    %c0_2 = arith.constant 0 : index
    %2 = vector.load %arg2[%c0_1, %c0_2] : memref<128x128xbf16, #tpu.memory_space<vmem>>, vector<128x128xbf16>
    %cst = arith.constant dense<0.000000e+00> : vector<8x128xf32>
    %3 = tpu.matmul %1, %2, %cst {dimension_numbers = #tpu.dot_dimension_numbers<[1], [0], [0], [1], [0, 0, 1, 1], [], []>} : vector<8x128xbf16>, vector<128x128xbf16>, vector<8x128xf32> -> vector<8x128xf32>
    %c0_3 = arith.constant 0 : index
    %c0_4 = arith.constant 0 : index
    %4 = vector.load %arg3[%c0_3, %c0_4] : memref<1x128xf32, #tpu.memory_space<vmem>>, vector<1x128xf32>
    %5 = vector.broadcast %4 : vector<1x128xf32> to vector<8x128xf32>
    %6 = arith.addf %3, %5 : vector<8x128xf32>
    %cst_5 = arith.constant 0.000000e+00 : f32
    %7 = vector.broadcast %cst_5 : f32 to vector<8x128xf32>
    %8 = arith.maximumf %6, %7 : vector<8x128xf32>
    %9 = arith.truncf %8 : vector<8x128xf32> to vector<8x128xbf16>
    %c0_6 = arith.constant 0 : index
    %c0_7 = arith.constant 0 : index
    %10 = vector.load %arg4[%c0_6, %c0_7] : memref<128x128xbf16, #tpu.memory_space<vmem>>, vector<128x128xbf16>
    %cst_8 = arith.constant dense<0.000000e+00> : vector<8x128xf32>
    %11 = tpu.matmul %9, %10, %cst_8 {dimension_numbers = #tpu.dot_dimension_numbers<[1], [0], [0], [1], [0, 0, 1, 1], [], []>} : vector<8x128xbf16>, vector<128x128xbf16>, vector<8x128xf32> -> vector<8x128xf32>
    %c0_9 = arith.constant 0 : index
    %c0_10 = arith.constant 0 : index
    %12 = vector.load %arg5[%c0_9, %c0_10] : memref<1x128xf32, #tpu.memory_space<vmem>>, vector<1x128xf32>
    %13 = vector.broadcast %12 : vector<1x128xf32> to vector<8x128xf32>
    %14 = arith.addf %11, %13 : vector<8x128xf32>
    %cst_11 = arith.constant 0.000000e+00 : f32
    %15 = vector.broadcast %cst_11 : f32 to vector<8x128xf32>
    %16 = arith.maximumf %14, %15 : vector<8x128xf32>
    %17 = arith.truncf %16 : vector<8x128xf32> to vector<8x128xbf16>
    %c0_12 = arith.constant 0 : index
    %c0_13 = arith.constant 0 : index
    %18 = vector.load %arg6[%c0_12, %c0_13] : memref<128x128xbf16, #tpu.memory_space<vmem>>, vector<128x128xbf16>
    %cst_14 = arith.constant dense<0.000000e+00> : vector<8x128xf32>
    %19 = tpu.matmul %17, %18, %cst_14 {dimension_numbers = #tpu.dot_dimension_numbers<[1], [0], [0], [1], [0, 0, 1, 1], [], []>} : vector<8x128xbf16>, vector<128x128xbf16>, vector<8x128xf32> -> vector<8x128xf32>
    %c0_15 = arith.constant 0 : index
    %c0_16 = arith.constant 0 : index
    %20 = vector.load %arg7[%c0_15, %c0_16] : memref<1x128xf32, #tpu.memory_space<vmem>>, vector<1x128xf32>
    %21 = vector.broadcast %20 : vector<1x128xf32> to vector<8x128xf32>
    %22 = arith.addf %19, %21 : vector<8x128xf32>
    %23 = math.tanh %22 : vector<8x128xf32>
    %c0_17 = arith.constant 0 : index
    %c0_18 = arith.constant 0 : index
    %24 = vector.load %arg8[%c0_17, %c0_18] : memref<8x128xf32, #tpu.memory_space<vmem>>, vector<8x128xf32>
    tpu.vector_store %arg8[%c0_17, %c0_18], %23 {strides = array<i32>} : memref<8x128xf32, #tpu.memory_space<vmem>>, vector<8x128xf32>,
    return
  }
  func.func @transform_0(%arg0: i32) -> (i32, i32) {
    %c0_i32 = arith.constant 0 : i32
    %c0_i32_0 = arith.constant 0 : i32
    return %arg0, %c0_i32 : i32, i32
  }
  func.func @transform_1(%arg0: i32) -> (i32, i32) {
    %c0_i32 = arith.constant 0 : i32
    %c0_i32_0 = arith.constant 0 : i32
    %c0_i32_1 = arith.constant 0 : i32
    return %c0_i32, %c0_i32_0 : i32, i32
  }
  func.func @transform_2(%arg0: i32) -> (i32, i32) {
    %c0_i32 = arith.constant 0 : i32
    %c0_i32_0 = arith.constant 0 : i32
    %c0_i32_1 = arith.constant 0 : i32
    return %c0_i32, %c0_i32_0 : i32, i32
  }
  func.func @transform_3(%arg0: i32) -> (i32, i32) {
    %c0_i32 = arith.constant 0 : i32
    %c0_i32_0 = arith.constant 0 : i32
    %c0_i32_1 = arith.constant 0 : i32
    return %c0_i32, %c0_i32_0 : i32, i32
  }
  func.func @transform_4(%arg0: i32) -> (i32, i32) {
    %c0_i32 = arith.constant 0 : i32
    %c0_i32_0 = arith.constant 0 : i32
    %c0_i32_1 = arith.constant 0 : i32
    return %c0_i32, %c0_i32_0 : i32, i32
  }
  func.func @transform_5(%arg0: i32) -> (i32, i32) {
    %c0_i32 = arith.constant 0 : i32
    %c0_i32_0 = arith.constant 0 : i32
    %c0_i32_1 = arith.constant 0 : i32
    return %c0_i32, %c0_i32_0 : i32, i32
  }
  func.func @transform_6(%arg0: i32) -> (i32, i32) {
    %c0_i32 = arith.constant 0 : i32
    %c0_i32_0 = arith.constant 0 : i32
    %c0_i32_1 = arith.constant 0 : i32
    return %c0_i32, %c0_i32_0 : i32, i32
  }
  func.func @transform_7(%arg0: i32) -> (i32, i32) {
    %c0_i32 = arith.constant 0 : i32
    %c0_i32_0 = arith.constant 0 : i32
    return %arg0, %c0_i32 : i32, i32
  }
}

module attributes {stable_mosaic.version = 11 : i64} {
  func.func @kernel(%arg0: i32, %arg1: memref<8x128xf32, #tpu.memory_space<vmem>>, %arg2: memref<128x128xbf16, #tpu.memory_space<vmem>>, %arg3: memref<1x128xf32, #tpu.memory_space<vmem>>, %arg4: memref<128x128xbf16, #tpu.memory_space<vmem>>, %arg5: memref<1x128xf32, #tpu.memory_space<vmem>>, %arg6: memref<128x128xbf16, #tpu.memory_space<vmem>>, %arg7: memref<1x128xf32, #tpu.memory_space<vmem>>, %arg8: memref<8x128xf32, #tpu.memory_space<vmem>>) attributes {dimension_semantics = [#tpu.dimension_semantics<arbitrary>], iteration_bounds = array<i64: 1>, scalar_prefetch = 0 : i64, scratch_operands = 0 : i64, tpu.core_type = #tpu.core_type<tc>, window_params = [{transform_indices = @transform_0, window_bounds = array<i64: 8, 128>}, {pipeline_mode = #tpu.pipeline_mode<synchronous>, transform_indices = @transform_1, window_bounds = array<i64: 128, 128>}, {pipeline_mode = #tpu.pipeline_mode<synchronous>, transform_indices = @transform_2, window_bounds = array<i64: 1, 128>}, {pipeline_mode = #tpu.pipeline_mode<synchronous>, transform_indices = @transform_3, window_bounds = array<i64: 128, 128>}, {pipeline_mode = #tpu.pipeline_mode<synchronous>, transform_indices = @transform_4, window_bounds = array<i64: 1, 128>}, {pipeline_mode = #tpu.pipeline_mode<synchronous>, transform_indices = @transform_5, window_bounds = array<i64: 128, 128>}, {pipeline_mode = #tpu.pipeline_mode<synchronous>, transform_indices = @transform_6, window_bounds = array<i64: 1, 128>}, {transform_indices = @transform_7, window_bounds = array<i64: 8, 128>}]} {
    %c0 = arith.constant 0 : index
    %c0_0 = arith.constant 0 : index
    %0 = vector.load %arg1[%c0, %c0_0] : memref<8x128xf32, #tpu.memory_space<vmem>>, vector<8x128xf32>
    %1 = arith.truncf %0 : vector<8x128xf32> to vector<8x128xbf16>
    %c0_1 = arith.constant 0 : index
    %c0_2 = arith.constant 0 : index
    %2 = vector.load %arg2[%c0_1, %c0_2] : memref<128x128xbf16, #tpu.memory_space<vmem>>, vector<128x128xbf16>
    %cst = arith.constant dense<0.000000e+00> : vector<8x128xf32>
    %3 = tpu.matmul %1, %2, %cst {dimension_numbers = #tpu.dot_dimension_numbers<[1], [0], [0], [1], [0, 0, 1, 1], [], []>} : vector<8x128xbf16>, vector<128x128xbf16>, vector<8x128xf32> -> vector<8x128xf32>
    %c0_3 = arith.constant 0 : index
    %c0_4 = arith.constant 0 : index
    %4 = vector.load %arg3[%c0_3, %c0_4] : memref<1x128xf32, #tpu.memory_space<vmem>>, vector<1x128xf32>
    %5 = vector.broadcast %4 : vector<1x128xf32> to vector<8x128xf32>
    %6 = arith.addf %3, %5 : vector<8x128xf32>
    %cst_5 = arith.constant 0.000000e+00 : f32
    %7 = vector.broadcast %cst_5 : f32 to vector<8x128xf32>
    %8 = arith.maximumf %6, %7 : vector<8x128xf32>
    %9 = arith.truncf %8 : vector<8x128xf32> to vector<8x128xbf16>
    %c0_6 = arith.constant 0 : index
    %c0_7 = arith.constant 0 : index
    %10 = vector.load %arg4[%c0_6, %c0_7] : memref<128x128xbf16, #tpu.memory_space<vmem>>, vector<128x128xbf16>
    %cst_8 = arith.constant dense<0.000000e+00> : vector<8x128xf32>
    %11 = tpu.matmul %9, %10, %cst_8 {dimension_numbers = #tpu.dot_dimension_numbers<[1], [0], [0], [1], [0, 0, 1, 1], [], []>} : vector<8x128xbf16>, vector<128x128xbf16>, vector<8x128xf32> -> vector<8x128xf32>
    %c0_9 = arith.constant 0 : index
    %c0_10 = arith.constant 0 : index
    %12 = vector.load %arg5[%c0_9, %c0_10] : memref<1x128xf32, #tpu.memory_space<vmem>>, vector<1x128xf32>
    %13 = vector.broadcast %12 : vector<1x128xf32> to vector<8x128xf32>
    %14 = arith.addf %11, %13 : vector<8x128xf32>
    %cst_11 = arith.constant 0.000000e+00 : f32
    %15 = vector.broadcast %cst_11 : f32 to vector<8x128xf32>
    %16 = arith.maximumf %14, %15 : vector<8x128xf32>
    %17 = arith.truncf %16 : vector<8x128xf32> to vector<8x128xbf16>
    %c0_12 = arith.constant 0 : index
    %c0_13 = arith.constant 0 : index
    %18 = vector.load %arg6[%c0_12, %c0_13] : memref<128x128xbf16, #tpu.memory_space<vmem>>, vector<128x128xbf16>
    %cst_14 = arith.constant dense<0.000000e+00> : vector<8x128xf32>
    %19 = tpu.matmul %17, %18, %cst_14 {dimension_numbers = #tpu.dot_dimension_numbers<[1], [0], [0], [1], [0, 0, 1, 1], [], []>} : vector<8x128xbf16>, vector<128x128xbf16>, vector<8x128xf32> -> vector<8x128xf32>
    %c0_15 = arith.constant 0 : index
    %c0_16 = arith.constant 0 : index
    %20 = vector.load %arg7[%c0_15, %c0_16] : memref<1x128xf32, #tpu.memory_space<vmem>>, vector<1x128xf32>
    %21 = vector.broadcast %20 : vector<1x128xf32> to vector<8x128xf32>
    %22 = arith.addf %19, %21 : vector<8x128xf32>
    %23 = math.tanh %22 : vector<8x128xf32>
    %c0_17 = arith.constant 0 : index
    %c0_18 = arith.constant 0 : index
    %24 = vector.load %arg8[%c0_17, %c0_18] : memref<8x128xf32, #tpu.memory_space<vmem>>, vector<8x128xf32>
    tpu.vector_store %arg8[%c0_17, %c0_18], %23 {strides = array<i32>} : memref<8x128xf32, #tpu.memory_space<vmem>>, vector<8x128xf32>,
    return
  }
  func.func @transform_0(%arg0: i32) -> (i32, i32) {
    %c0_i32 = arith.constant 0 : i32
    %c0_i32_0 = arith.constant 0 : i32
    return %arg0, %c0_i32 : i32, i32
  }
  func.func @transform_1(%arg0: i32) -> (i32, i32) {
    %c0_i32 = arith.constant 0 : i32
    %c0_i32_0 = arith.constant 0 : i32
    %c0_i32_1 = arith.constant 0 : i32
    return %c0_i32, %c0_i32_0 : i32, i32
  }
  func.func @transform_2(%arg0: i32) -> (i32, i32) {
    %c0_i32 = arith.constant 0 : i32
    %c0_i32_0 = arith.constant 0 : i32
    %c0_i32_1 = arith.constant 0 : i32
    return %c0_i32, %c0_i32_0 : i32, i32
  }
  func.func @transform_3(%arg0: i32) -> (i32, i32) {
    %c0_i32 = arith.constant 0 : i32
    %c0_i32_0 = arith.constant 0 : i32
    %c0_i32_1 = arith.constant 0 : i32
    return %c0_i32, %c0_i32_0 : i32, i32
  }
  func.func @transform_4(%arg0: i32) -> (i32, i32) {
    %c0_i32 = arith.constant 0 : i32
    %c0_i32_0 = arith.constant 0 : i32
    %c0_i32_1 = arith.constant 0 : i32
    return %c0_i32, %c0_i32_0 : i32, i32
  }
  func.func @transform_5(%arg0: i32) -> (i32, i32) {
    %c0_i32 = arith.constant 0 : i32
    %c0_i32_0 = arith.constant 0 : i32
    %c0_i32_1 = arith.constant 0 : i32
    return %c0_i32, %c0_i32_0 : i32, i32
  }
  func.func @transform_6(%arg0: i32) -> (i32, i32) {
    %c0_i32 = arith.constant 0 : i32
    %c0_i32_0 = arith.constant 0 : i32
    %c0_i32_1 = arith.constant 0 : i32
    return %c0_i32, %c0_i32_0 : i32, i32
  }
  func.func @transform_7(%arg0: i32) -> (i32, i32) {
    %c0_i32 = arith.constant 0 : i32
    %c0_i32_0 = arith.constant 0 : i32
    return %arg0, %c0_i32 : i32, i32
  }
}

</mosaic_0001>

<bundles_post_ra>
// kernel: tpu_custom_call.1
= control target key start
LH: loop header
LB: loop body
LE: loop exit
PB: predicated region body
PF: predicated region fallthrough
CT: control target
= control target key end

     0   :  { %12 = vsyncpa [#allocation3], 0  ;;  %s689_s0 = inlined_call_operand.hbm [shape: f32[8,128], index: 0, kind: input, shape index: {}]   ;;  %s690_s1 = inlined_call_operand.hbm [shape: bf16[128,128], index: 1, kind: input, shape index: {}]   ;;  %s691_s2 = inlined_call_operand.vmem [shape: f32[1,128], index: 2, kind: input, shape index: {}]   ;;  %s692_s3 = inlined_call_operand.hbm [shape: bf16[128,128], index: 3, kind: input, shape index: {}]   ;;  %s693_s4 = inlined_call_operand.vmem [shape: f32[1,128], index: 4, kind: input, shape index: {}]   ;;  %s694_s5 = inlined_call_operand.hbm [shape: bf16[128,128], index: 5, kind: input, shape index: {}]   ;;  %s695_s6 = inlined_call_operand.vmem [shape: f32[1,128], index: 6, kind: input, shape index: {}]   ;;  %s696_s7 = inlined_call_operand.hbm [shape: f32[8,128], index: 7, kind: output, shape index: {}]  }
   0x1   :  { %13 = vsyncpa [#allocation6], 0 }
   0x2   :  { %14 = vsyncpa [#allocation9], 0  ;;  %s31_s26 = sshll.u32 %s690_s1, 4  ;;  %s32_s26 = int_to_ptr.hbm [resolvable:$true] %s31_s26 }
   0x3   :  { %15 = vsyncpa [#allocation4], 0  ;;  %s618_s27 = smov [#allocation5]   ;;  %s21_s8 = sshll.u32 %s689_s0, 4  ;;  %s22_s8 = int_to_ptr.hbm [resolvable:$true] %s21_s8 }
   0x4   :  { %s33_s28 = sshll.u32 %s618_s27, 4  ;;  %s619_s9 = smov 64   ;;  %s34_s28 = int_to_ptr.vmem [resolvable:$true] %s33_s28 }
   0x5   :  { %s620_s10 = smov 4   ;;  %s621_s11 = smov [#allocation2]  }
   0x6   :  { %39 = dma.hbm_to_vmem [thread:$0]  %s32_s26, 1024, %s34_s28, [#allocation6], %s619_s9, %s619_s9, %s620_s10  }
   0x7   :  { %s23_s12 = sshll.u32 %s621_s11, 4  ;;  %s46_s15 = sshll.u32 %s692_s3, 4  ;;  %s24_s12 = int_to_ptr.vmem [resolvable:$true] %s23_s12  ;;  %s47_s15 = int_to_ptr.hbm [resolvable:$true] %s46_s15 }
   0x8   :  { %26 = dma.hbm_to_vmem [thread:$0]  %s22_s8, 128, %s24_s12, [#allocation3]  }
   0x9   :  { %s61_s17 = sshll.u32 %s694_s5, 4  ;;  %s622_s18 = smov [#allocation7]   ;;  %s62_s17 = int_to_ptr.hbm [resolvable:$true] %s61_s17 }
   0xa   :  { %s48_s19 = sshll.u32 %s622_s18, 4  ;;  %s623_s0 = smov [#allocation8]   ;;  %s49_s19 = int_to_ptr.vmem [resolvable:$true] %s48_s19 }
   0xb   :  { %54 = dma.hbm_to_vmem [thread:$0]  %s47_s15, 1024, %s49_s19, [#allocation6], %s619_s9, %s619_s9, %s620_s10  }
   0xc   :  { %s63_s20 = sshll.u32 %s623_s0, 4  ;;  %s64_s20 = int_to_ptr.vmem [resolvable:$true] %s63_s20 }
   0xd   :  { %69 = dma.hbm_to_vmem [thread:$0]  %s62_s17, 1024, %s64_s20, [#allocation9], %s619_s9, %s619_s9, %s620_s10  }
   0xe   :  { %610 = dma.done.wait [#allocation3], 128  }
   0xf   :  { %611 = vsyncadd [#allocation3], 4294967168 }
  0x10   :  { %612 = dma.done.wait [#allocation6], 2048  }
  0x11   :  { %613 = vsyncadd [#allocation6], 4294965248 }
  0x12   :  { %614 = dma.done.wait [#allocation9], 1024  }
  0x13   :  { %615 = vsyncadd [#allocation9], 4294966272  ;;  %v461_v0 = vld [vmem:[#allocation5 + $0x38] sm:$0xff]  ;;  %v460_v1 = vld [vmem:[#allocation5 + $0x30] sm:$0xff]  ;;  %s624_s24 = smov [#allocation10]   ;;  %s346_s28 = sshll.u32 %s696_s7, 4  ;;  %s347_s28 = int_to_ptr.hbm [resolvable:$true] %s346_s28 }
  0x14   :  { %158 = vmatpush.bf16.msra.mxu0 %v461_v0  ;;  %v469_v2 = vld [vmem:[#allocation7 + $0x38] sm:$0xff]  ;;  %v468_v3 = vld [vmem:[#allocation7 + $0x30] sm:$0xff]  ;;  %v459_v4 = vld [vmem:[#allocation5 + $0x28] sm:$0xff]  ;;  %s344_s25 = sshll.u32 %s624_s24, 4  ;;  %s345_s25 = int_to_ptr.vmem [resolvable:$true] %s344_s25 }
  0x15   :  { %241 = vmatpush.bf16.msra.mxu1 %v469_v2  ;;  %v467_v5 = vld [vmem:[#allocation7 + $0x28] sm:$0xff]  ;;  %v458_v6 = vld [vmem:[#allocation5 + $0x20] sm:$0xff]  ;;  %v457_v8 = vld [vmem:[#allocation5 + $0x18] sm:$0xff] }
  0x16   :  { %v466_v7 = vld [vmem:[#allocation7 + $0x20] sm:$0xff]  ;;  %v465_v9 = vld [vmem:[#allocation7 + $0x18] sm:$0xff]  ;;  %v456_v10 = vld [vmem:[#allocation5 + $0x10] sm:$0xff] }
  0x17   :  { %v464_v11 = vld [vmem:[#allocation7 + $0x10] sm:$0xff]  ;;  %v455_v12 = vld [vmem:[#allocation5 + $0x8] sm:$0xff]  ;;  %v454_v13 = vld [vmem:[#allocation5] sm:$0xff] }
  0x18   :  { %159 = vmatpush.bf16.msra.mxu0 %v460_v1  ;;  %v88_v14 = vld [vmem:[#allocation2] sm:$0xff]  ;;  %v463_v16 = vld [vmem:[#allocation7 + $0x8] sm:$0xff]  ;;  %v462_v17 = vld [vmem:[#allocation7] sm:$0xff] }
  0x19   :  { %242 = vmatpush.bf16.msra.mxu1 %v468_v3  ;;  %v89_v15 = vpack.c.bf16 %v88_v14, %v88_v14  ;;  %v477_v18 = vld [vmem:[#allocation8 + $0x38] sm:$0xff]  ;;  %v476_v19 = vld [vmem:[#allocation8 + $0x30] sm:$0xff]  ;;  %v475_v20 = vld [vmem:[#allocation8 + $0x28] sm:$0xff] }
  0x1a   :  { %324 = vmatpush.bf16.msra.mxu2 %v477_v18  ;;  %v474_v21 = vld [vmem:[#allocation8 + $0x20] sm:$0xff]  ;;  %v473_v22 = vld [vmem:[#allocation8 + $0x18] sm:$0xff]  ;;  %v472_v23 = vld [vmem:[#allocation8 + $0x10] sm:$0xff] }
  0x1b   :  { %v485_v24 = vld [vmem:[%s691_s2] ss:$0 sm:$0xff]  ;;  %v471_v30 = vld [vmem:[#allocation8 + $0x8] sm:$0xff]  ;;  %v470_v31 = vld [vmem:[#allocation8] sm:$0xff] }
  0x1c   :  { %160 = vmatpush.bf16.msra.mxu0 %v459_v4  ;;  %v486_v32 = vld [vmem:[%s693_s4] ss:$0 sm:$0xff] }
  0x1d   :  { %243 = vmatpush.bf16.msra.mxu1 %v467_v5  ;;  %v487_v38 = vld [vmem:[%s695_s6] ss:$0 sm:$0xff] }
  0x1e   :  { %325 = vmatpush.bf16.msra.mxu2 %v476_v19 }
  0x20   :  { %161 = vmatpush.bf16.msra.mxu0 %v458_v6 }
  0x21   :  { %244 = vmatpush.bf16.msra.mxu1 %v466_v7 }
  0x22   :  { %326 = vmatpush.bf16.msra.mxu2 %v475_v20 }
  0x24   :  { %162 = vmatpush.bf16.msra.mxu0 %v457_v8 }
  0x25   :  { %245 = vmatpush.bf16.msra.mxu1 %v465_v9 }
  0x26   :  { %327 = vmatpush.bf16.msra.mxu2 %v474_v21 }
  0x28   :  { %163 = vmatpush.bf16.msra.mxu0 %v456_v10 }
  0x29   :  { %246 = vmatpush.bf16.msra.mxu1 %v464_v11 }
  0x2a   :  { %328 = vmatpush.bf16.msra.mxu2 %v473_v22 }
  0x2c   :  { %164 = vmatpush.bf16.msra.mxu0 %v455_v12 }
  0x2d   :  { %247 = vmatpush.bf16.msra.mxu1 %v463_v16 }
  0x2e   :  { %329 = vmatpush.bf16.msra.mxu2 %v472_v23 }
  0x30   :  { %165 = vmatpush.bf16.msra.mxu0 %v454_v13 }
  0x31   :  { %248 = vmatpush.bf16.msra.mxu1 %v462_v17 }
  0x32   :  { %330 = vmatpush.bf16.msra.mxu2 %v471_v30 }
  0x33   :  { %166 = vmatmul.bf16.vlgmr.msra.gmra.mxu0 %v89_v15 }
  0x36   :  { %331 = vmatpush.bf16.msra.mxu2 %v470_v31 }
  0xb0   :  { %v167_v25 = vpop.f32.mrf.mxu0 }
  0xb1   :  { %v168_v26 = vadd.f32 %v485_v24, %v167_v25 }
  0xb3   :  { %v171_v27 = vmax.f32 %v168_v26, 0.0 }
  0xb5   :  { %v172_v28 = vpack.c.bf16 %v171_v27, %v171_v27 }
  0xb7   :  { %249 = vmatmul.bf16.vlgmr.msra.gmra.mxu1 %v172_v28 }
  0xb8   :  { %v169_v29 = vpop.f32.mrf.mxu0 }
 0x134   :  { %v250_v33 = vpop.f32.mrf.mxu1 }
 0x135   :  { %v251_v34 = vadd.f32 %v486_v32, %v250_v33 }
 0x137   :  { %v254_v35 = vmax.f32 %v251_v34, 0.0 }
 0x139   :  { %v255_v36 = vpack.c.bf16 %v254_v35, %v254_v35 }
 0x13b   :  { %332 = vmatmul.bf16.vlgmr.msra.gmra.mxu2 %v255_v36 }
 0x13c   :  { %v252_v37 = vpop.f32.mrf.mxu1 }
 0x1be   :  { %v333_v39 = vpop.f32.mrf.mxu2 }
 0x1bf   :  { %v334_v40 = vadd.f32 %v487_v38, %v333_v39 }
 0x1c1   :  { %488 = vtanh.f32 %v334_v40 }
 0x1c6   :  { %v335_v41 = vpop.f32.mrf.mxu2 }
 0x1c7   :  { %v489_v42 = vpop.eup %488 }
 0x1c8   :  { %338 = vst [vmem:[#allocation10] sm:$0xff] %v489_v42 }
 0x1c9   :  { %349 = dma.vmem_to_hbm [thread:$0]  %s345_s25, 128, %s347_s28, [#allocation4]  }
 0x1ca   :  { %616 = dma.done.wait [#allocation4], 128  }
 0x1cb   :  { %617 = vsyncadd [#allocation4], 4294967168 }
 0x1cc   :  { %354 = vsyncpa [#allocation3], 1 }
 0x1cd   :  { %355 = vsyncpa [#allocation6], 1 }
 0x1ce   :  { %356 = vsyncpa [#allocation9], 1 }
 0x1cf   :  { %357 = vsyncpa [#allocation4], 1 }

// kernel: tpu_custom_call.1
= control target key start
LH: loop header
LB: loop body
LE: loop exit
PB: predicated region body
PF: predicated region fallthrough
CT: control target
= control target key end

     0   :  { %12 = vsyncpa [#allocation3], 0  ;;  %s689_s0 = inlined_call_operand.hbm [shape: f32[8,128], index: 0, kind: input, shape index: {}]   ;;  %s690_s1 = inlined_call_operand.hbm [shape: bf16[128,128], index: 1, kind: input, shape index: {}]   ;;  %s691_s2 = inlined_call_operand.vmem [shape: f32[1,128], index: 2, kind: input, shape index: {}]   ;;  %s692_s3 = inlined_call_operand.hbm [shape: bf16[128,128], index: 3, kind: input, shape index: {}]   ;;  %s693_s4 = inlined_call_operand.vmem [shape: f32[1,128], index: 4, kind: input, shape index: {}]   ;;  %s694_s5 = inlined_call_operand.hbm [shape: bf16[128,128], index: 5, kind: input, shape index: {}]   ;;  %s695_s6 = inlined_call_operand.vmem [shape: f32[1,128], index: 6, kind: input, shape index: {}]   ;;  %s696_s7 = inlined_call_operand.hbm [shape: f32[8,128], index: 7, kind: output, shape index: {}]  }
   0x1   :  { %13 = vsyncpa [#allocation6], 0 }
   0x2   :  { %14 = vsyncpa [#allocation9], 0  ;;  %s31_s26 = sshll.u32 %s690_s1, 4  ;;  %s32_s26 = int_to_ptr.hbm [resolvable:$true] %s31_s26 }
   0x3   :  { %15 = vsyncpa [#allocation4], 0  ;;  %s618_s27 = smov [#allocation5]   ;;  %s21_s8 = sshll.u32 %s689_s0, 4  ;;  %s22_s8 = int_to_ptr.hbm [resolvable:$true] %s21_s8 }
   0x4   :  { %s33_s28 = sshll.u32 %s618_s27, 4  ;;  %s619_s9 = smov 64   ;;  %s34_s28 = int_to_ptr.vmem [resolvable:$true] %s33_s28 }
   0x5   :  { %s620_s10 = smov 4   ;;  %s621_s11 = smov [#allocation2]  }
   0x6   :  { %39 = dma.hbm_to_vmem [thread:$0]  %s32_s26, 1024, %s34_s28, [#allocation6], %s619_s9, %s619_s9, %s620_s10  }
   0x7   :  { %s23_s12 = sshll.u32 %s621_s11, 4  ;;  %s46_s15 = sshll.u32 %s692_s3, 4  ;;  %s24_s12 = int_to_ptr.vmem [resolvable:$true] %s23_s12  ;;  %s47_s15 = int_to_ptr.hbm [resolvable:$true] %s46_s15 }
   0x8   :  { %26 = dma.hbm_to_vmem [thread:$0]  %s22_s8, 128, %s24_s12, [#allocation3]  }
   0x9   :  { %s61_s17 = sshll.u32 %s694_s5, 4  ;;  %s622_s18 = smov [#allocation7]   ;;  %s62_s17 = int_to_ptr.hbm [resolvable:$true] %s61_s17 }
   0xa   :  { %s48_s19 = sshll.u32 %s622_s18, 4  ;;  %s623_s0 = smov [#allocation8]   ;;  %s49_s19 = int_to_ptr.vmem [resolvable:$true] %s48_s19 }
   0xb   :  { %54 = dma.hbm_to_vmem [thread:$0]  %s47_s15, 1024, %s49_s19, [#allocation6], %s619_s9, %s619_s9, %s620_s10  }
   0xc   :  { %s63_s20 = sshll.u32 %s623_s0, 4  ;;  %s64_s20 = int_to_ptr.vmem [resolvable:$true] %s63_s20 }
   0xd   :  { %69 = dma.hbm_to_vmem [thread:$0]  %s62_s17, 1024, %s64_s20, [#allocation9], %s619_s9, %s619_s9, %s620_s10  }
   0xe   :  { %610 = dma.done.wait [#allocation3], 128  }
   0xf   :  { %611 = vsyncadd [#allocation3], 4294967168 }
  0x10   :  { %612 = dma.done.wait [#allocation6], 2048  }
  0x11   :  { %613 = vsyncadd [#allocation6], 4294965248 }
  0x12   :  { %614 = dma.done.wait [#allocation9], 1024  }
  0x13   :  { %615 = vsyncadd [#allocation9], 4294966272  ;;  %v461_v0 = vld [vmem:[#allocation5 + $0x38] sm:$0xff]  ;;  %v460_v1 = vld [vmem:[#allocation5 + $0x30] sm:$0xff]  ;;  %s624_s24 = smov [#allocation10]   ;;  %s346_s28 = sshll.u32 %s696_s7, 4  ;;  %s347_s28 = int_to_ptr.hbm [resolvable:$true] %s346_s28 }
  0x14   :  { %158 = vmatpush.bf16.msra.mxu0 %v461_v0  ;;  %v469_v2 = vld [vmem:[#allocation7 + $0x38] sm:$0xff]  ;;  %v468_v3 = vld [vmem:[#allocation7 + $0x30] sm:$0xff]  ;;  %v459_v4 = vld [vmem:[#allocation5 + $0x28] sm:$0xff]  ;;  %s344_s25 = sshll.u32 %s624_s24, 4  ;;  %s345_s25 = int_to_ptr.vmem [resolvable:$true] %s344_s25 }
  0x15   :  { %241 = vmatpush.bf16.msra.mxu1 %v469_v2  ;;  %v467_v5 = vld [vmem:[#allocation7 + $0x28] sm:$0xff]  ;;  %v458_v6 = vld [vmem:[#allocation5 + $0x20] sm:$0xff]  ;;  %v457_v8 = vld [vmem:[#allocation5 + $0x18] sm:$0xff] }
  0x16   :  { %v466_v7 = vld [vmem:[#allocation7 + $0x20] sm:$0xff]  ;;  %v465_v9 = vld [vmem:[#allocation7 + $0x18] sm:$0xff]  ;;  %v456_v10 = vld [vmem:[#allocation5 + $0x10] sm:$0xff] }
  0x17   :  { %v464_v11 = vld [vmem:[#allocation7 + $0x10] sm:$0xff]  ;;  %v455_v12 = vld [vmem:[#allocation5 + $0x8] sm:$0xff]  ;;  %v454_v13 = vld [vmem:[#allocation5] sm:$0xff] }
  0x18   :  { %159 = vmatpush.bf16.msra.mxu0 %v460_v1  ;;  %v88_v14 = vld [vmem:[#allocation2] sm:$0xff]  ;;  %v463_v16 = vld [vmem:[#allocation7 + $0x8] sm:$0xff]  ;;  %v462_v17 = vld [vmem:[#allocation7] sm:$0xff] }
  0x19   :  { %242 = vmatpush.bf16.msra.mxu1 %v468_v3  ;;  %v89_v15 = vpack.c.bf16 %v88_v14, %v88_v14  ;;  %v477_v18 = vld [vmem:[#allocation8 + $0x38] sm:$0xff]  ;;  %v476_v19 = vld [vmem:[#allocation8 + $0x30] sm:$0xff]  ;;  %v475_v20 = vld [vmem:[#allocation8 + $0x28] sm:$0xff] }
  0x1a   :  { %324 = vmatpush.bf16.msra.mxu2 %v477_v18  ;;  %v474_v21 = vld [vmem:[#allocation8 + $0x20] sm:$0xff]  ;;  %v473_v22 = vld [vmem:[#allocation8 + $0x18] sm:$0xff]  ;;  %v472_v23 = vld [vmem:[#allocation8 + $0x10] sm:$0xff] }
  0x1b   :  { %v485_v24 = vld [vmem:[%s691_s2] ss:$0 sm:$0xff]  ;;  %v471_v30 = vld [vmem:[#allocation8 + $0x8] sm:$0xff]  ;;  %v470_v31 = vld [vmem:[#allocation8] sm:$0xff] }
  0x1c   :  { %160 = vmatpush.bf16.msra.mxu0 %v459_v4  ;;  %v486_v32 = vld [vmem:[%s693_s4] ss:$0 sm:$0xff] }
  0x1d   :  { %243 = vmatpush.bf16.msra.mxu1 %v467_v5  ;;  %v487_v38 = vld [vmem:[%s695_s6] ss:$0 sm:$0xff] }
  0x1e   :  { %325 = vmatpush.bf16.msra.mxu2 %v476_v19 }
  0x20   :  { %161 = vmatpush.bf16.msra.mxu0 %v458_v6 }
  0x21   :  { %244 = vmatpush.bf16.msra.mxu1 %v466_v7 }
  0x22   :  { %326 = vmatpush.bf16.msra.mxu2 %v475_v20 }
  0x24   :  { %162 = vmatpush.bf16.msra.mxu0 %v457_v8 }
  0x25   :  { %245 = vmatpush.bf16.msra.mxu1 %v465_v9 }
  0x26   :  { %327 = vmatpush.bf16.msra.mxu2 %v474_v21 }
  0x28   :  { %163 = vmatpush.bf16.msra.mxu0 %v456_v10 }
  0x29   :  { %246 = vmatpush.bf16.msra.mxu1 %v464_v11 }
  0x2a   :  { %328 = vmatpush.bf16.msra.mxu2 %v473_v22 }
  0x2c   :  { %164 = vmatpush.bf16.msra.mxu0 %v455_v12 }
  0x2d   :  { %247 = vmatpush.bf16.msra.mxu1 %v463_v16 }
  0x2e   :  { %329 = vmatpush.bf16.msra.mxu2 %v472_v23 }
  0x30   :  { %165 = vmatpush.bf16.msra.mxu0 %v454_v13 }
  0x31   :  { %248 = vmatpush.bf16.msra.mxu1 %v462_v17 }
  0x32   :  { %330 = vmatpush.bf16.msra.mxu2 %v471_v30 }
  0x33   :  { %166 = vmatmul.bf16.vlgmr.msra.gmra.mxu0 %v89_v15 }
  0x36   :  { %331 = vmatpush.bf16.msra.mxu2 %v470_v31 }
  0xb0   :  { %v167_v25 = vpop.f32.mrf.mxu0 }
  0xb1   :  { %v168_v26 = vadd.f32 %v485_v24, %v167_v25 }
  0xb3   :  { %v171_v27 = vmax.f32 %v168_v26, 0.0 }
  0xb5   :  { %v172_v28 = vpack.c.bf16 %v171_v27, %v171_v27 }
  0xb7   :  { %249 = vmatmul.bf16.vlgmr.msra.gmra.mxu1 %v172_v28 }
  0xb8   :  { %v169_v29 = vpop.f32.mrf.mxu0 }
 0x134   :  { %v250_v33 = vpop.f32.mrf.mxu1 }
 0x135   :  { %v251_v34 = vadd.f32 %v486_v32, %v250_v33 }
 0x137   :  { %v254_v35 = vmax.f32 %v251_v34, 0.0 }
 0x139   :  { %v255_v36 = vpack.c.bf16 %v254_v35, %v254_v35 }
 0x13b   :  { %332 = vmatmul.bf16.vlgmr.msra.gmra.mxu2 %v255_v36 }
 0x13c   :  { %v252_v37 = vpop.f32.mrf.mxu1 }
 0x1be   :  { %v333_v39 = vpop.f32.mrf.mxu2 }
 0x1bf   :  { %v334_v40 = vadd.f32 %v487_v38, %v333_v39 }
 0x1c1   :  { %488 = vtanh.f32 %v334_v40 }
 0x1c6   :  { %v335_v41 = vpop.f32.mrf.mxu2 }
 0x1c7   :  { %v489_v42 = vpop.eup %488 }
 0x1c8   :  { %338 = vst [vmem:[#allocation10] sm:$0xff] %v489_v42 }
 0x1c9   :  { %349 = dma.vmem_to_hbm [thread:$0]  %s345_s25, 128, %s347_s28, [#allocation4]  }
 0x1ca   :  { %616 = dma.done.wait [#allocation4], 128  }
 0x1cb   :  { %617 = vsyncadd [#allocation4], 4294967168 }
 0x1cc   :  { %354 = vsyncpa [#allocation3], 1 }
 0x1cd   :  { %355 = vsyncpa [#allocation6], 1 }
 0x1ce   :  { %356 = vsyncpa [#allocation9], 1 }
 0x1cf   :  { %357 = vsyncpa [#allocation4], 1 }

</bundles_post_ra>
